<compile_context>
chip_gen: v5e
topology: v5e:2x2
jax: 0.10.0
libtpu: 0.0.40
codegen_flags: <defaults>
</compile_context>

<pallas_src>
import jax
import jax.numpy as jnp
from jax import lax
from jax.experimental import pallas as pl
from jax.experimental.pallas import tpu as pltpu


# ----------------------------------------------------------------------------
# Pallas kernels
# ----------------------------------------------------------------------------
def _linear_mix_kernel(x_ref, w_ref, b_ref, o_ref):
    # x: [1, Cin, N*T]   w: [Cout, Cin]   b: [Cout, 1]   o: [1, Cout, N*T]
    # One MXU matmul per batch element; output store is lane-dense (N*T lanes).
    o_ref[0] = (
        jnp.dot(w_ref[...], x_ref[0], preferred_element_type=jnp.float32)
        + b_ref[...]
    ).astype(o_ref.dtype)


def _gcn_fused_kernel(v_ref, vin_ref, at_ref, wk_ref, b_ref, o_ref):
    # v_ref  : [1, C, N, T]          per-batch input features
    # vin_ref: [1, Cout, N, T]       residual / skip input
    # at_ref : [S, N, N]             pre-transposed adjacencies (VMEM-resident)
    # wk_ref : [(S+1)*C, Cout, 1, 1] weight-normed 1x1 weights, concat order
    # b_ref  : [Cout, 1, 1]          bias
    # o_ref  : [1, Cout, N, T]
    #
    # out[o,m,t] = sum_c W0[o,c] V[c,m,t]
    #            + sum_s sum_c Ws[o,c] (A_s^T V)[c,m,t]  + b[o] + V_in[o,m,t]
    v = v_ref[0]                                   # [C, N, T]
    cin = v.shape[0]
    n_sup = at_ref.shape[0]
    nn = at_ref.shape[1]

    # residual + bias (f32 accumulator)
    acc = vin_ref[0].astype(jnp.float32) + b_ref[...]            # [Cout, N, T]

    # identity block of the (virtual) channel concat: k = 0 .. C-1
    for c in range(cin):
        acc = acc + wk_ref[c] * v[c]

    # diffusion blocks: k = (s+1)*C .. (s+2)*C - 1
    for s in range(n_sup):
        a_t = jnp.broadcast_to(at_ref[s], (cin, nn, nn))          # [C, N, N]
        # batched over channels: d[c,m,t] = sum_n A_s[n,m] * v[c,n,t]
        d = jnp.einsum(
            "cmn,cnt->cmt", a_t, v, preferred_element_type=jnp.float32
        )                                                         # [C, N, T]
        base = (s + 1) * cin
        for c in range(cin):
            acc = acc + wk_ref[base + c] * d[c]

    o_ref[0] = acc.astype(o_ref.dtype)


# ----------------------------------------------------------------------------
# Pallas-backed building blocks
# ----------------------------------------------------------------------------
def linear1x1(V, w_oi, b_col, *, compute_dtype=None):
    """Weight-(already)-normalized 1x1 conv over NCHW input, one fused matmul.

    V: [B, Cin, N, T]  ->  [B, Cout, N, T]
    w_oi: [Cout, Cin]   b_col: [Cout, 1]
    """
    B, Cin, N, T = V.shape
    Cout = w_oi.shape[0]
    NT = N * T
    out_dtype = V.dtype

    x = V.reshape(B, Cin, NT)              # free reshape, no transpose, no copy
    if compute_dtype is not None:          # e.g. bf16 on v5e; accumulate in f32
        x = x.astype(compute_dtype)
        w_oi = w_oi.astype(compute_dtype)

    out = pl.pallas_call(
        _linear_mix_kernel,
        out_shape=jax.ShapeDtypeStruct((B, Cout, NT), out_dtype),
        grid=(B,),
        in_specs=[
            pl.BlockSpec((1, Cin, NT), lambda b: (b, 0, 0)),
            pl.BlockSpec((Cout, Cin), lambda b: (0, 0)),   # resident
            pl.BlockSpec((Cout, 1), lambda b: (0, 0)),     # resident
        ],
        out_specs=pl.BlockSpec((1, Cout, NT), lambda b: (b, 0, 0)),
        compiler_params=pltpu.CompilerParams(dimension_semantics=("parallel",)),
    )(x, w_oi, b_col)
    return out.reshape(B, Cout, N, T)


def gcn_fused(V, supports, V_in, w_k, b_col3, *, compute_dtype=None):
    """Fused: diffusion over all supports + channel concat + 1x1 mix + residual.

    V: [B, C, N, T]   supports: list of [N, N]   V_in: [B, Cout, N, T]
    w_k: [(S+1)*C, Cout, 1, 1]   b_col3: [Cout, 1, 1]
    """
    B, C, N, T = V.shape
    Cout = V_in.shape[1]
    S = len(supports)
    K = (S + 1) * C
    assert w_k.shape == (K, Cout, 1, 1), (w_k.shape, K, Cout)
    out_dtype = V.dtype

    # Hoisted glue (tiny, once per call): transpose + stack adjacencies so the
    # kernel never transposes and keeps them resident across grid steps.
    at_stack = jnp.transpose(jnp.stack(supports, axis=0), (0, 2, 1))  # [S,N,N]

    if compute_dtype is not None:
        V = V.astype(compute_dtype)
        at_stack = at_stack.astype(compute_dtype)

    return pl.pallas_call(
        _gcn_fused_kernel,
        out_shape=jax.ShapeDtypeStruct((B, Cout, N, T), out_dtype),
        grid=(B,),
        in_specs=[
            pl.BlockSpec((1, C, N, T), lambda b: (b, 0, 0, 0)),
            pl.BlockSpec((1, Cout, N, T), lambda b: (b, 0, 0, 0)),
            pl.BlockSpec((S, N, N), lambda b: (0, 0, 0)),          # resident
            pl.BlockSpec((K, Cout, 1, 1), lambda b: (0, 0, 0, 0)),  # resident
            pl.BlockSpec((Cout, 1, 1), lambda b: (0, 0, 0)),        # resident
        ],
        out_specs=pl.BlockSpec((1, Cout, N, T), lambda b: (b, 0, 0, 0)),
        compiler_params=pltpu.CompilerParams(dimension_semantics=("parallel",)),
    )(V, V_in, at_stack, w_k, b_col3)


# ----------------------------------------------------------------------------
# Parameter setup glue (plain JAX)
# ----------------------------------------------------------------------------
def weight_norm_effective(v, g):
    # PyTorch weight_norm default (dim=0): normalize over all axes but dim 0.
    norm = jnp.sqrt(jnp.sum(v * v, axis=tuple(range(1, v.ndim)), keepdims=True))
    return g * v / norm


# ----------------------------------------------------------------------------
# Concrete operations (what operations_new.py would supply)
# ----------------------------------------------------------------------------
def make_linear_op(cin, cout, key, *, compute_dtype=None):
    k1, k2, k3 = jax.random.split(key, 3)
    v = jax.random.normal(k1, (cout, cin, 1, 1), jnp.float32) * 0.1
    g = jax.random.normal(k2, (cout, 1, 1, 1), jnp.float32) * 0.1 + 1.0
    b = jax.random.normal(k3, (cout,), jnp.float32) * 0.01
    w = weight_norm_effective(v, g)[:, :, 0, 0]      # [cout, cin]  (hoisted)
    b_col = b.reshape(cout, 1)                       # (hoisted)

    def op(V):
        return linear1x1(V, w, b_col, compute_dtype=compute_dtype)

    def reference(V):  # pure-JAX check
        return (
            jnp.einsum("oc,bcnt->bont", w, V, precision=lax.Precision.HIGHEST)
            + b[None, :, None, None]
        )

    op.reference = reference
    return op


def make_gcn_op(cin, cout, n_supports, key, *, compute_dtype=None):
    # mixes [V, A1@V, A2@V, ..., Aadp@V] (virtual channel concat) with a
    # weight-normalized 1x1 conv and a fused residual add of V_in.
    k1, k2, k3 = jax.random.split(key, 3)
    k_total = cin * (n_supports + 1)
    v = jax.random.normal(k1, (cout, k_total, 1, 1), jnp.float32) * 0.1
    g = jax.random.normal(k2, (cout, 1, 1, 1), jnp.float32) * 0.1 + 1.0
    b = jax.random.normal(k3, (cout,), jnp.float32) * 0.01
    w = weight_norm_effective(v, g)[:, :, 0, 0]               # [cout, k_total]
    # repack weights once so the kernel only does leading-axis indexing
    w_k = jnp.transpose(w, (1, 0)).reshape(k_total, cout, 1, 1)
    b_col3 = b.reshape(cout, 1, 1)

    def op(V, G, V_in, adp):
        supports = list(G)
        if adp is not None:
            supports.append(adp)
        assert len(supports) == n_supports, "support count must match weights"
        return gcn_fused(V, supports, V_in, w_k, b_col3,
                         compute_dtype=compute_dtype)

    def reference(V, G, V_in, adp):  # pure-JAX check
        supports = list(G)
        if adp is not None:
            supports.append(adp)
        feats = [V] + [
            jnp.einsum("bcnt,nm->bcmt", V, A, precision=lax.Precision.HIGHEST)
            for A in supports
        ]
        h = jnp.concatenate(feats, axis=1)
        return (
            jnp.einsum("ok,bknt->bont", w, h, precision=lax.Precision.HIGHEST)
            + b[None, :, None, None]
            + V_in
        )

    op.reference = reference
    return op


# ----------------------------------------------------------------------------
# G_Package: exact dispatch semantics of the PyTorch module
# ----------------------------------------------------------------------------
class GPackage:
    def __init__(self, args, operation):
        self.args = args
        self.operation = operation

    def __call__(self, V, G=None, V_in=None, adp=None):
        # TODO(synk): `operation` is an arbitrary injected callable in the
        # original module; here it is bound to the Pallas-backed ops above.
        if G:
            output = self.operation(V, G, V_in, adp)
        else:
            output = self.operation(V)
        return output


# ----------------------------------------------------------------------------
# Demo / smoke test
# ----------------------------------------------------------------------------
if __name__ == "__main__":
    key = jax.random.PRNGKey(0)
    kx, ka1, ka2, kad, kvin, kop1, kop2 = jax.random.split(key, 7)

    B, C, N, T = 2, 4, 16, 16      # NCHW: batch, channels, nodes, time
    COUT = 8

    V = jax.random.normal(kx, (B, C, N, T), jnp.float32)
    A1 = jax.nn.softmax(jax.random.normal(ka1, (N, N), jnp.float32), axis=-1)
    A2 = jax.nn.softmax(jax.random.normal(ka2, (N, N), jnp.float32), axis=-1)
    adp = jax.nn.softmax(jax.random.normal(kad, (N, N), jnp.float32), axis=-1)
    V_in = jax.random.normal(kvin, (B, COUT, N, T), jnp.float32)

    # Branch 1: no G -> operation(V)   (weight-norm 1x1 conv, fused matmul)
    pkg_lin = GPackage(args=None, operation=make_linear_op(C, COUT, kop1))
    out_lin = pkg_lin(V)
    jax.block_until_ready(out_lin)
    assert out_lin.shape == (B, COUT, N, T)
    assert jnp.allclose(out_lin, pkg_lin.operation.reference(V),
                        rtol=2e-2, atol=2e-2)

    # Branch 2: G given -> operation(V, G, V_in, adp)   (fused graph conv)
    pkg_gcn = GPackage(args=None, operation=make_gcn_op(C, COUT, 3, kop2))
    out_gcn = pkg_gcn(V, G=[A1, A2], V_in=V_in, adp=adp)
    jax.block_until_ready(out_gcn)
    assert out_gcn.shape == (B, COUT, N, T)
    ref_gcn = pkg_gcn.operation.reference(V, [A1, A2], V_in, adp)
    assert jnp.allclose(out_gcn, ref_gcn, rtol=2e-2, atol=2e-2)

    print("KERNEL_OK")
</pallas_src>

<mosaic_0001>
module attributes {stable_mosaic.version = 11 : i64} {
  func.func @_linear_mix_kernel(%arg0: i32, %arg1: memref<1x4x256xf32, #tpu.memory_space<vmem>>, %arg2: memref<8x4xf32, #tpu.memory_space<vmem>>, %arg3: memref<8x1xf32, #tpu.memory_space<vmem>>, %arg4: memref<1x8x256xf32, #tpu.memory_space<vmem>>) attributes {dimension_semantics = [#tpu.dimension_semantics<parallel>], iteration_bounds = array<i64: 2>, scalar_prefetch = 0 : i64, scratch_operands = 0 : i64, tpu.core_type = #tpu.core_type<tc>, window_params = [{transform_indices = @transform_0, window_bounds = array<i64: 1, 4, 256>}, {pipeline_mode = #tpu.pipeline_mode<synchronous>, transform_indices = @transform_1, window_bounds = array<i64: 8, 4>}, {pipeline_mode = #tpu.pipeline_mode<synchronous>, transform_indices = @transform_2, window_bounds = array<i64: 8, 1>}, {transform_indices = @transform_3, window_bounds = array<i64: 1, 8, 256>}]} {
    %c0 = arith.constant 0 : index
    %c0_0 = arith.constant 0 : index
    %0 = vector.load %arg2[%c0, %c0_0] : memref<8x4xf32, #tpu.memory_space<vmem>>, vector<8x4xf32>
    %c0_1 = arith.constant 0 : index
    %c0_2 = arith.constant 0 : index
    %c0_3 = arith.constant 0 : index
    %1 = vector.load %arg1[%c0_1, %c0_2, %c0_3] : memref<1x4x256xf32, #tpu.memory_space<vmem>>, vector<1x4x256xf32>
    %2 = vector.shape_cast %1 : vector<1x4x256xf32> to vector<4x256xf32>
    %cst = arith.constant dense<0.000000e+00> : vector<8x256xf32>
    %3 = tpu.matmul %0, %2, %cst {dimension_numbers = #tpu.dot_dimension_numbers<[1], [0], [0], [1], [0, 0, 1, 1], [], []>} : vector<8x4xf32>, vector<4x256xf32>, vector<8x256xf32> -> vector<8x256xf32>
    %c0_4 = arith.constant 0 : index
    %c0_5 = arith.constant 0 : index
    %4 = vector.load %arg3[%c0_4, %c0_5] : memref<8x1xf32, #tpu.memory_space<vmem>>, vector<8x1xf32>
    %5 = vector.broadcast %4 : vector<8x1xf32> to vector<8x256xf32>
    %6 = arith.addf %3, %5 : vector<8x256xf32>
    %c0_6 = arith.constant 0 : index
    %c0_7 = arith.constant 0 : index
    %c0_8 = arith.constant 0 : index
    %7 = vector.load %arg4[%c0_6, %c0_7, %c0_8] : memref<1x8x256xf32, #tpu.memory_space<vmem>>, vector<1x8x256xf32>
    %8 = vector.shape_cast %7 : vector<1x8x256xf32> to vector<8x256xf32>
    %9 = vector.shape_cast %6 : vector<8x256xf32> to vector<1x8x256xf32>
    tpu.vector_store %arg4[%c0_6, %c0_7, %c0_8], %9 {strides = array<i32>} : memref<1x8x256xf32, #tpu.memory_space<vmem>>, vector<1x8x256xf32>,
    return
  }
  func.func @transform_0(%arg0: i32) -> (i32, i32, i32) {
    %c0_i32 = arith.constant 0 : i32
    %c0_i32_0 = arith.constant 0 : i32
    %c0_i32_1 = arith.constant 0 : i32
    return %arg0, %c0_i32, %c0_i32_0 : i32, i32, i32
  }
  func.func @transform_1(%arg0: i32) -> (i32, i32) {
    %c0_i32 = arith.constant 0 : i32
    %c0_i32_0 = arith.constant 0 : i32
    %c0_i32_1 = arith.constant 0 : i32
    return %c0_i32, %c0_i32_0 : i32, i32
  }
  func.func @transform_2(%arg0: i32) -> (i32, i32) {
    %c0_i32 = arith.constant 0 : i32
    %c0_i32_0 = arith.constant 0 : i32
    %c0_i32_1 = arith.constant 0 : i32
    return %c0_i32, %c0_i32_0 : i32, i32
  }
  func.func @transform_3(%arg0: i32) -> (i32, i32, i32) {
    %c0_i32 = arith.constant 0 : i32
    %c0_i32_0 = arith.constant 0 : i32
    %c0_i32_1 = arith.constant 0 : i32
    return %arg0, %c0_i32, %c0_i32_0 : i32, i32, i32
  }
}

</mosaic_0001>

<bundles_post_ra>
// kernel: tpu_custom_call.1
= control target key start
LH: loop header
LB: loop body
LE: loop exit
PB: predicated region body
PF: predicated region fallthrough
CT: control target
= control target key end

     0   :  { %8 = vsyncpa [#allocation3], 0  ;;  %s543_s0 = inlined_call_operand.vmem [shape: f32[2,4,256], index: 0, kind: input, shape index: {}]   ;;  %s544_s1 = inlined_call_operand.vmem [shape: f32[8,4], index: 1, kind: input, shape index: {}]   ;;  %s545_s2 = inlined_call_operand.vmem [shape: f32[8,1], index: 2, kind: input, shape index: {}]   ;;  %s546_s3 = inlined_call_operand.hbm [shape: f32[2,8,256], index: 3, kind: output, shape index: {}]  }
   0x1   :  { %10 = vsyncpa [#allocation3 + $0x1], 0  ;;  %s452_s12 = smov 0   ;;  %s454_s13 = smov 0  }
   0x2   :  { %s456_s14 = smov 0   ;;  %s458_s15 = smov 0  }
   0x3 LB: > { %s473_s16 = sadd.s32 4294967295, %s429_s15   ;;  %s308_s17 = sadd.s32 4294967294, %s429_s15   ;;  %s429_s15 = sphi %s458_s15, %s552_s15   ;;  %s425_s14 = sphi %s456_s14, %s551_s14   ;;  %s421_s13 = sphi %s454_s13, %s550_s13   ;;  %s417_s12 = sphi %s452_s12, %s549_s12  }
   0x4   : > { %s477_s18 = sadd.s32 1, %s429_s15   ;;  %s91_s19 = sadd.s32 1, %s425_s14 }
   0x5   : > { %s88_s20 = ssub.s32 %s429_s15, %s477_s18  ;;  %p101_p0 = scmp.ne.s32.totalorder %s425_s14, %s421_s13 }
   0x6   : > { %p89_p1 = scmp.eq.s32.totalorder %s88_s20, 0  ;;  %p102_p2 = scmp.eq.s32.totalorder %s473_s16, 1 }
   0x7   : > { %p107_p3 = scmp.ne.s32.totalorder %s421_s13, %s417_s12  ;;  %p108_p4 = scmp.eq.s32.totalorder %s308_s17, 1 }
   0x8   : > { %s488_s21 = scalar_select %p89_p1, %s425_s14, %s91_s19  }
   0x9   : > { %p490_p5 = por %p102_p2, %p101_p0  ;;  %p494_p6 = por %p108_p4, %p107_p3 }
   0xa   : > { %p311_p7 = scmp.ge.s32.totalorder %s429_s15, 1  ;;  %p140_p8 = scmp.lt.s32.totalorder %s429_s15, 3 }
   0xc   : > { %p141_p9 = pnand %p311_p7, %p140_p8 }
   0xd   : > { %p164_p10 = scmp.lt.s32.totalorder (!%p141_p9), %s473_s16, 1  ;;  %s161_s6 = sand.u32 (!%p141_p9), 1, %s421_s13  }
   0xe   : > { %144 = sbr.rel (%p141_p9) target bundleno = 165 (0xa5), region = 32  ;;  %s312_s7 = sshll.u32 (!%p141_p9), %s161_s6, 4 }
   0xf   : > { %s325_s8 = sshll.u32 (!%p141_p9), %s473_s16, 4  ;;  %s163_s17 = scalar_lea.vmem (!%p141_p9), [#allocation2], %s312_s7 }
  0x10   : > { %s244_s11 = scalar_lea.hbm (!%p141_p9), %s546_s3, %s325_s8  ;;  %s246_s19 = sshll.u32 (!%p141_p9), %s163_s17, 4  ;;  %s247_s19 = int_to_ptr.vmem [resolvable:$true] %s246_s19 }
  0x11   : > { %s248_s20 = sshll.u32 (!%p141_p9), %s244_s11, 4  ;;  %s233_s24 = scalar_lea.sflag (!%p141_p9), [#allocation3], %s161_s6  ;;  %s249_s20 = int_to_ptr.hbm [resolvable:$true] %s248_s20 }
  0x12   : > { %s381_s25 = sshra.s32 (!%p141_p9), %s249_s20, 4  ;;  %s387_s28 = scalar_lea.hbm (!%p141_p9), %s546_s3, 32  ;;  %s382_s25 = int_to_ptr.hbm [resolvable:$true] %s381_s25 }
  0x13   : > { %v171_v0 = vld [vmem:[%s545_s2] sm:$0xff]  ;;  %v431_v1 = vmov 0   ;;  %s165_s26 = scalar_select %p164_p10, %s473_s16, 1  ;;  %vm185_vm0 = vcmask 1043456   ;;  %vm181_vm1 = vcmask 31744  }
  0x14   : > { %366 = vset.pattern.permute.xlu0 %v431_v1  ;;  %v169_v3 = vld [vmem:[%s544_s1] sm:$0xff]  ;;  %s383_s16 = scalar_lea.hbm %s382_s25, 16  ;;  %p388_p0 = scmp.lt.s32.totalorder %s382_s25, %s546_s3 }
  0x15   : > { %174 = vperm.xlu0 %366, %v171_v0   ;;  %s324_s27 = sshll.u32 %s165_s26, 3  ;;  %p384_p11 = scmp.ne.s32.totalorder %s382_s25, %s383_s16 }
  0x16   : > { %s168_s30 = scalar_lea.vmem %s543_s0, %s324_s27  ;;  %p389_p1 = scmp.lt.s32.totalorder %s387_s28, %s383_s16 }
  0x17   : > { %v170_v2 = vld [vmem:[%s168_s30] sm:$0xff]  ;;  %p385_p12 = pnand %p384_p11, %p490_p5 }
  0x18   : > { %178 = vst [vmem:[#allocation1] ss:$2 sm:$0xff] %v170_v2  ;;  %p390_p2 = por %p389_p1, %p388_p0 }
  0x19   : > { %p386_p13 = pneg %p385_p12 }
  0x1b   : > { %p391_p3 = pnand %p390_p2, %p386_p13 }
  0x1f   : > { %v179_v4 = vld.sshfl [vmem:[#allocation1] sm:$0xff pattern:$0x75316420]  ;;  %v180_v5 = vld.sshfl [vmem:[#allocation1 + $0x8] sm:$0xff pattern:$0x75316420] }
  0x20   : > { %315 = vmatpush.msk.msra.mxu0 %vm185_vm0, %v179_v4  ;;  %317 = vmatpush.msk.msra.mxu1 %vm185_vm0, %v180_v5 }
  0x21   : > { %316 = vmatmul.msk.f32.vlgmr.msra.gmra.mxu0 %vm181_vm1, %v169_v3  ;;  %318 = vmatmul.msk.f32.vlgmr.msra.gmra.mxu1 %vm181_vm1, %v169_v3 }
  0x87   : > { %v175_v6 = vpop.permute.xlu0 %174 }
  0x9e   : > { %v207_v7 = vpop.f32.mrf.mxu0  ;;  %v227_v8 = vpop.f32.mrf.mxu1 }
  0x9f   : > { %v208_v9 = vadd.f32 %v207_v7, %v175_v6  ;;  %v228_v10 = vadd.f32 %v227_v8, %v175_v6 }
  0xa1   : > { %230 = vst [vmem:[%s163_s17] sm:$0xff] %v208_v9 }
  0xa2   : > { %231 = vst [vmem:[%s163_s17 + $0x8] sm:$0xff] %v228_v10 }
  0xa3   : > { %394 = shalt.err (!%p391_p3)
}
  0xa4   : > { %326 = dma.vmem_to_hbm [thread:$0]  (%p490_p5), %s247_s19, 256, %s249_s20, %s233_s24  }
  0xa5 PF: > { %p332_p4 = scmp.ge.s32.totalorder %s429_s15, 2  ;;  %s260_s4 = sand.u32 1, %s417_s12  }
  0xa6   : > { %s261_s5 = scalar_lea.sflag [#allocation3], %s260_s4 }
  0xa7   : > { %p329_p7 = pnand %p332_p4, %p494_p6 }
  0xa9   : > { %p330_p8 = pneg %p329_p7 }
  0xab   : > { %412 = dma.done.wait (%p330_p8), %s261_s5, 256  }
  0xac   : > { %414 = vsyncadd (%p330_p8), %s261_s5, 4294967040  ;;  %p13_p9 = scmp.ge.s32.totalorder %s477_s18, 4   ;;  %s549_s12 = smov %s421_s13 }
  0xad   : > { %s550_s13 = smov %s425_s14  ;;  %s551_s14 = smov %s488_s21 }
  0xae   : > { %s552_s15 = smov %s477_s18  ;;  %15 = sbr.rel (!%p13_p9) target bundleno = 3 (0x3), region = 67 }
  0xb3   :  { %267 = vsyncpa [#allocation3], 1 }
  0xb4   :  { %269 = vsyncpa [#allocation3 + $0x1], 1 }

</bundles_post_ra>
